<compile_context>
chip_gen: v6e
topology: v6e:2x2x1
jax: 0.10.0
libtpu: 0.0.40
codegen_flags: <defaults>
</compile_context>

<pallas_src>
import functools
import math

import numpy as np
import jax
import jax.numpy as jnp
from jax.experimental import pallas as pl
from jax.experimental.pallas import tpu as pltpu


def _round_up(x, m):
    return ((x + m - 1) // m) * m


# ----------------------------------------------------------------------------
# Pallas kernel: fused sigmoid + BCE + Dice per-row partial sums
# ----------------------------------------------------------------------------
def _bce_dice_partials_kernel(pred_ref, true_ref,
                              bce_ref, inter_ref, psum_ref, tsum_ref,
                              *, dcols, t_d):
    k = pl.program_id(0)
    nk = pl.num_programs(0)

    @pl.when(k == 0)
    def _init():
        bce_ref[...] = jnp.zeros_like(bce_ref)
        inter_ref[...] = jnp.zeros_like(inter_ref)
        psum_ref[...] = jnp.zeros_like(psum_ref)
        tsum_ref[...] = jnp.zeros_like(tsum_ref)

    def _accumulate(mask):
        x = pred_ref[...]                       # (rows, t_d) logits
        y = true_ref[...]                       # (rows, t_d) targets
        if mask is not None:
            # Boundary-block contents past the array edge are undefined; select
            # them to harmless values BEFORE any transcendental touches them.
            x = jnp.where(mask, x, 0.0)
            y = jnp.where(mask, y, 0.0)

        # softplus(-x) computed once (exp + log1p); everything else is derived:
        #   sigmoid(x)       = exp(-softplus(-x))
        #   log(sigmoid(x))  = -softplus(-x)
        #   log(1-sigmoid)   = -softplus(x) = -(x + softplus(-x))
        sp_neg = jnp.maximum(-x, 0.0) + jnp.log1p(jnp.exp(-jnp.abs(x)))
        p = jnp.exp(-sp_neg)                                   # sigmoid(x)
        log_p = jnp.maximum(-sp_neg, -100.0)                   # torch BCELoss clamp
        log_1mp = jnp.maximum(-(x + sp_neg), -100.0)
        bce = -(y * log_p + (1.0 - y) * log_1mp)

        if mask is not None:
            # Zeroed inputs are not enough: bce(0,0) = log 2, sigmoid(0) = 0.5.
            bce = jnp.where(mask, bce, 0.0)
            p = jnp.where(mask, p, 0.0)

        # Per-row lane reductions (XLU), accumulated into resident output blocks.
        bce_ref[...] += jnp.sum(bce, axis=1, keepdims=True)
        inter_ref[...] += jnp.sum(p * y, axis=1, keepdims=True)
        psum_ref[...] += jnp.sum(p, axis=1, keepdims=True)
        tsum_ref[...] += jnp.sum(y, axis=1, keepdims=True)

    rem = dcols % t_d                           # static Python int
    if rem == 0:
        _accumulate(None)                       # fast unmasked path, every step
    else:
        @pl.when(k < nk - 1)
        def _full_chunks():
            _accumulate(None)

        @pl.when(k == nk - 1)
        def _ragged_tail():
            col = jax.lax.broadcasted_iota(jnp.int32, pred_ref.shape, 1)
            _accumulate(col < rem)


# ----------------------------------------------------------------------------
# Wrapper
# ----------------------------------------------------------------------------
@functools.partial(jax.jit, static_argnames=("smooth", "block_bytes"))
def bce_dice_loss(y_pred, y_true, smooth=1e-6, block_bytes=4 * 1024 * 1024):
    """y_pred: (N, 1, H, W) logits.  y_true: (N, H, W) in [0, 1]."""
    n = y_pred.shape[0]
    d = int(np.prod(y_pred.shape[1:]))
    assert y_true.shape[0] == n and int(np.prod(y_true.shape[1:])) == d

    # Free row-major reshapes (no HBM copies); inputs are already f32.
    pred2d = y_pred.reshape(n, d).astype(jnp.float32)
    true2d = y_true.reshape(n, d).astype(jnp.float32)

    # Sublane fold for tiny batches: (n, d) -> (n*F, d/F) so rows become a
    # multiple of 8 when possible (avoids wasting 6/8 sublanes of every vreg).
    fold = 8 // math.gcd(n, 8)
    if fold > 1 and d % fold != 0:
        fold = 1
    rows = n * fold
    dcols = d // fold
    pred2d = pred2d.reshape(rows, dcols)
    true2d = true2d.reshape(rows, dcols)

    # Tile selection by block bytes (not a fixed lane cap). Keep the
    # double-buffered footprint (2 inputs x 2 buffers x block) small enough
    # for every TPU generation (v7x: 64 MiB physical VMEM).
    block_bytes = min(int(block_bytes), 12 * 1024 * 1024)
    if dcols <= 128 or rows * dcols * 4 <= block_bytes:
        t_d = dcols                              # single full-width block
    else:
        t_d = min((dcols // 128) * 128,
                  max(128, (block_bytes // (rows * 4)) // 128 * 128))
    grid = (pl.cdiv(dcols, t_d),)

    actual_block = _round_up(rows, 8) * t_d * 4
    vmem_limit = int(min(64 * 1024 * 1024,
                         max(16 * 1024 * 1024, 4 * actual_block + (2 << 20))))

    kernel = functools.partial(_bce_dice_partials_kernel, dcols=dcols, t_d=t_d)

    row_col = jax.ShapeDtypeStruct((rows, 1), jnp.float32)
    out_spec = pl.BlockSpec((rows, 1), lambda k: (0, 0))

    bce_rows, inter_rows, psum_rows, tsum_rows = pl.pallas_call(
        kernel,
        out_shape=(row_col, row_col, row_col, row_col),
        grid_spec=pltpu.PrefetchScalarGridSpec(
            num_scalar_prefetch=0,
            grid=grid,
            in_specs=[
                pl.BlockSpec((rows, t_d), lambda k: (0, k)),
                pl.BlockSpec((rows, t_d), lambda k: (0, k)),
            ],
            out_specs=(out_spec, out_spec, out_spec, out_spec),
        ),
        compiler_params=pltpu.CompilerParams(
            dimension_semantics=("arbitrary",),
            vmem_limit_bytes=vmem_limit),
    )(pred2d, true2d)

    # Tiny JAX epilogue: regroup folded rows per sample and form the scalar loss.
    bce_loss = jnp.sum(bce_rows) / float(n * d)
    inter = jnp.sum(inter_rows.reshape(n, fold), axis=1)
    union = jnp.sum((psum_rows + tsum_rows).reshape(n, fold), axis=1)
    dice = (2.0 * inter + float(smooth)) / (union + float(smooth))
    return bce_loss + (1.0 - jnp.mean(dice))


# ----------------------------------------------------------------------------
# Pure-JAX reference (mirrors the PyTorch module) for correctness checks.
# ----------------------------------------------------------------------------
def _ref_bce_dice_loss(y_pred, y_true, smooth=1e-6):
    y_t = y_true[:, None].astype(jnp.float32)          # unsqueeze(1)
    p = jax.nn.sigmoid(y_pred.astype(jnp.float32))
    log_p = jnp.maximum(jnp.log(p), -100.0)
    log_1mp = jnp.maximum(jnp.log(1.0 - p), -100.0)
    bce = jnp.mean(-(y_t * log_p + (1.0 - y_t) * log_1mp))
    inter = jnp.sum(p * y_t, axis=(1, 2, 3))
    union = jnp.sum(p, axis=(1, 2, 3)) + jnp.sum(y_t, axis=(1, 2, 3))
    dice = (2.0 * inter + smooth) / (union + smooth)
    return bce + (1.0 - jnp.mean(dice))


# ----------------------------------------------------------------------------
if __name__ == "__main__":
    key = jax.random.PRNGKey(0)

    def run_case(n, h, w, block_bytes=4 * 1024 * 1024):
        k1, k2 = jax.random.split(jax.random.fold_in(key, n * 10007 + h * 131 + w))
        y_pred = jax.random.normal(k1, (n, 1, h, w), dtype=jnp.float32)
        y_true = (jax.random.uniform(k2, (n, h, w)) > 0.5).astype(jnp.float32)
        out = jax.block_until_ready(
            bce_dice_loss(y_pred, y_true, block_bytes=block_bytes))
        ref = jax.block_until_ready(_ref_bce_dice_loss(y_pred, y_true))
        assert out.shape == (), out.shape
        assert bool(jnp.isfinite(out)), out
        np.testing.assert_allclose(np.asarray(out), np.asarray(ref),
                                   rtol=1e-5, atol=1e-5)

    # 1) canonical small shape: sublane-folded rows, single full-width block
    run_case(2, 16, 16)
    # 2) forces a multi-chunk reduction grid with a ragged (masked) last chunk
    run_case(2, 48, 48, block_bytes=8192)
    # 3) fold impossible (d not divisible), rows < 8, full-dim block
    run_case(2, 15, 15)

    print("KERNEL_OK")
</pallas_src>

<mosaic_0001>
module attributes {stable_mosaic.version = 11 : i64} {
  func.func @_bce_dice_partials_kernel(%arg0: i32, %arg1: memref<8x64xf32, #tpu.memory_space<vmem>>, %arg2: memref<8x64xf32, #tpu.memory_space<vmem>>, %arg3: memref<8x1xf32, #tpu.memory_space<vmem>>, %arg4: memref<8x1xf32, #tpu.memory_space<vmem>>, %arg5: memref<8x1xf32, #tpu.memory_space<vmem>>, %arg6: memref<8x1xf32, #tpu.memory_space<vmem>>) attributes {dimension_semantics = [#tpu.dimension_semantics<arbitrary>], iteration_bounds = array<i64: 1>, scalar_prefetch = 0 : i64, scratch_operands = 0 : i64, tpu.core_type = #tpu.core_type<tc>, window_params = [{transform_indices = @transform_0, window_bounds = array<i64: 8, 64>}, {transform_indices = @transform_1, window_bounds = array<i64: 8, 64>}, {pipeline_mode = #tpu.pipeline_mode<synchronous>, transform_indices = @transform_2, window_bounds = array<i64: 8, 1>}, {pipeline_mode = #tpu.pipeline_mode<synchronous>, transform_indices = @transform_3, window_bounds = array<i64: 8, 1>}, {pipeline_mode = #tpu.pipeline_mode<synchronous>, transform_indices = @transform_4, window_bounds = array<i64: 8, 1>}, {pipeline_mode = #tpu.pipeline_mode<synchronous>, transform_indices = @transform_5, window_bounds = array<i64: 8, 1>}]} {
    %c0_i32 = arith.constant 0 : i32
    %0 = arith.cmpi eq, %arg0, %c0_i32 : i32
    %1 = arith.extui %0 : i1 to i32
    %c0_i32_0 = arith.constant 0 : i32
    %2 = arith.cmpi ne, %1, %c0_i32_0 : i32
    scf.if %2 {
      %cst_33 = arith.constant 0.000000e+00 : f32
      %55 = vector.broadcast %cst_33 : f32 to vector<8x1xf32>
      %c0_34 = arith.constant 0 : index
      %c0_35 = arith.constant 0 : index
      %56 = vector.load %arg3[%c0_34, %c0_35] : memref<8x1xf32, #tpu.memory_space<vmem>>, vector<8x1xf32>
      tpu.vector_store %arg3[%c0_34, %c0_35], %55 {strides = array<i32>} : memref<8x1xf32, #tpu.memory_space<vmem>>, vector<8x1xf32>,
      %cst_36 = arith.constant 0.000000e+00 : f32
      %57 = vector.broadcast %cst_36 : f32 to vector<8x1xf32>
      %c0_37 = arith.constant 0 : index
      %c0_38 = arith.constant 0 : index
      %58 = vector.load %arg4[%c0_37, %c0_38] : memref<8x1xf32, #tpu.memory_space<vmem>>, vector<8x1xf32>
      tpu.vector_store %arg4[%c0_37, %c0_38], %57 {strides = array<i32>} : memref<8x1xf32, #tpu.memory_space<vmem>>, vector<8x1xf32>,
      %cst_39 = arith.constant 0.000000e+00 : f32
      %59 = vector.broadcast %cst_39 : f32 to vector<8x1xf32>
      %c0_40 = arith.constant 0 : index
      %c0_41 = arith.constant 0 : index
      %60 = vector.load %arg5[%c0_40, %c0_41] : memref<8x1xf32, #tpu.memory_space<vmem>>, vector<8x1xf32>
      tpu.vector_store %arg5[%c0_40, %c0_41], %59 {strides = array<i32>} : memref<8x1xf32, #tpu.memory_space<vmem>>, vector<8x1xf32>,
      %cst_42 = arith.constant 0.000000e+00 : f32
      %61 = vector.broadcast %cst_42 : f32 to vector<8x1xf32>
      %c0_43 = arith.constant 0 : index
      %c0_44 = arith.constant 0 : index
      %62 = vector.load %arg6[%c0_43, %c0_44] : memref<8x1xf32, #tpu.memory_space<vmem>>, vector<8x1xf32>
      tpu.vector_store %arg6[%c0_43, %c0_44], %61 {strides = array<i32>} : memref<8x1xf32, #tpu.memory_space<vmem>>, vector<8x1xf32>,
    } else {
    }
    %c0 = arith.constant 0 : index
    %c0_1 = arith.constant 0 : index
    %3 = vector.load %arg1[%c0, %c0_1] : memref<8x64xf32, #tpu.memory_space<vmem>>, vector<8x64xf32>
    %c0_2 = arith.constant 0 : index
    %c0_3 = arith.constant 0 : index
    %4 = vector.load %arg2[%c0_2, %c0_3] : memref<8x64xf32, #tpu.memory_space<vmem>>, vector<8x64xf32>
    %cst = arith.constant 0.000000e+00 : f32
    %5 = vector.broadcast %cst : f32 to vector<8x64xf32>
    %6 = arith.subf %5, %3 : vector<8x64xf32>
    %cst_4 = arith.constant 0.000000e+00 : f32
    %7 = vector.broadcast %cst_4 : f32 to vector<8x64xf32>
    %8 = arith.maximumf %6, %7 : vector<8x64xf32>
    %9 = math.absf %3 : vector<8x64xf32>
    %cst_5 = arith.constant 0.000000e+00 : f32
    %10 = vector.broadcast %cst_5 : f32 to vector<8x64xf32>
    %11 = arith.subf %10, %9 : vector<8x64xf32>
    %12 = math.exp %11 : vector<8x64xf32>
    %13 = math.log1p %12 : vector<8x64xf32>
    %14 = arith.addf %8, %13 : vector<8x64xf32>
    %cst_6 = arith.constant 0.000000e+00 : f32
    %15 = vector.broadcast %cst_6 : f32 to vector<8x64xf32>
    %16 = arith.subf %15, %14 : vector<8x64xf32>
    %17 = math.exp %16 : vector<8x64xf32>
    %cst_7 = arith.constant 0.000000e+00 : f32
    %18 = vector.broadcast %cst_7 : f32 to vector<8x64xf32>
    %19 = arith.subf %18, %14 : vector<8x64xf32>
    %cst_8 = arith.constant -1.000000e+02 : f32
    %20 = vector.broadcast %cst_8 : f32 to vector<8x64xf32>
    %21 = arith.maximumf %19, %20 : vector<8x64xf32>
    %22 = arith.addf %3, %14 : vector<8x64xf32>
    %cst_9 = arith.constant 0.000000e+00 : f32
    %23 = vector.broadcast %cst_9 : f32 to vector<8x64xf32>
    %24 = arith.subf %23, %22 : vector<8x64xf32>
    %cst_10 = arith.constant -1.000000e+02 : f32
    %25 = vector.broadcast %cst_10 : f32 to vector<8x64xf32>
    %26 = arith.maximumf %24, %25 : vector<8x64xf32>
    %27 = arith.mulf %4, %21 : vector<8x64xf32>
    %cst_11 = arith.constant 1.000000e+00 : f32
    %28 = vector.broadcast %cst_11 : f32 to vector<8x64xf32>
    %29 = arith.subf %28, %4 : vector<8x64xf32>
    %30 = arith.mulf %29, %26 : vector<8x64xf32>
    %31 = arith.addf %27, %30 : vector<8x64xf32>
    %cst_12 = arith.constant 0.000000e+00 : f32
    %32 = vector.broadcast %cst_12 : f32 to vector<8x64xf32>
    %33 = arith.subf %32, %31 : vector<8x64xf32>
    %c0_13 = arith.constant 0 : index
    %c0_14 = arith.constant 0 : index
    %34 = vector.load %arg3[%c0_13, %c0_14] : memref<8x1xf32, #tpu.memory_space<vmem>>, vector<8x1xf32>
    %cst_15 = arith.constant dense<0.000000e+00> : vector<8xf32>
    %35 = vector.multi_reduction <add>, %33, %cst_15 [1] : vector<8x64xf32> to vector<8xf32>
    %36 = vector.shape_cast %35 : vector<8xf32> to vector<8x1xf32>
    %37 = arith.addf %34, %36 : vector<8x1xf32>
    %c0_16 = arith.constant 0 : index
    %c0_17 = arith.constant 0 : index
    %38 = vector.load %arg3[%c0_16, %c0_17] : memref<8x1xf32, #tpu.memory_space<vmem>>, vector<8x1xf32>
    tpu.vector_store %arg3[%c0_16, %c0_17], %37 {strides = array<i32>} : memref<8x1xf32, #tpu.memory_space<vmem>>, vector<8x1xf32>,
    %c0_18 = arith.constant 0 : index
    %c0_19 = arith.constant 0 : index
    %39 = vector.load %arg4[%c0_18, %c0_19] : memref<8x1xf32, #tpu.memory_space<vmem>>, vector<8x1xf32>
    %40 = arith.mulf %17, %4 : vector<8x64xf32>
    %cst_20 = arith.constant dense<0.000000e+00> : vector<8xf32>
    %41 = vector.multi_reduction <add>, %40, %cst_20 [1] : vector<8x64xf32> to vector<8xf32>
    %42 = vector.shape_cast %41 : vector<8xf32> to vector<8x1xf32>
    %43 = arith.addf %39, %42 : vector<8x1xf32>
    %c0_21 = arith.constant 0 : index
    %c0_22 = arith.constant 0 : index
    %44 = vector.load %arg4[%c0_21, %c0_22] : memref<8x1xf32, #tpu.memory_space<vmem>>, vector<8x1xf32>
    tpu.vector_store %arg4[%c0_21, %c0_22], %43 {strides = array<i32>} : memref<8x1xf32, #tpu.memory_space<vmem>>, vector<8x1xf32>,
    %c0_23 = arith.constant 0 : index
    %c0_24 = arith.constant 0 : index
    %45 = vector.load %arg5[%c0_23, %c0_24] : memref<8x1xf32, #tpu.memory_space<vmem>>, vector<8x1xf32>
    %cst_25 = arith.constant dense<0.000000e+00> : vector<8xf32>
    %46 = vector.multi_reduction <add>, %17, %cst_25 [1] : vector<8x64xf32> to vector<8xf32>
    %47 = vector.shape_cast %46 : vector<8xf32> to vector<8x1xf32>
    %48 = arith.addf %45, %47 : vector<8x1xf32>
    %c0_26 = arith.constant 0 : index
    %c0_27 = arith.constant 0 : index
    %49 = vector.load %arg5[%c0_26, %c0_27] : memref<8x1xf32, #tpu.memory_space<vmem>>, vector<8x1xf32>
    tpu.vector_store %arg5[%c0_26, %c0_27], %48 {strides = array<i32>} : memref<8x1xf32, #tpu.memory_space<vmem>>, vector<8x1xf32>,
    %c0_28 = arith.constant 0 : index
    %c0_29 = arith.constant 0 : index
    %50 = vector.load %arg6[%c0_28, %c0_29] : memref<8x1xf32, #tpu.memory_space<vmem>>, vector<8x1xf32>
    %cst_30 = arith.constant dense<0.000000e+00> : vector<8xf32>
    %51 = vector.multi_reduction <add>, %4, %cst_30 [1] : vector<8x64xf32> to vector<8xf32>
    %52 = vector.shape_cast %51 : vector<8xf32> to vector<8x1xf32>
    %53 = arith.addf %50, %52 : vector<8x1xf32>
    %c0_31 = arith.constant 0 : index
    %c0_32 = arith.constant 0 : index
    %54 = vector.load %arg6[%c0_31, %c0_32] : memref<8x1xf32, #tpu.memory_space<vmem>>, vector<8x1xf32>
    tpu.vector_store %arg6[%c0_31, %c0_32], %53 {strides = array<i32>} : memref<8x1xf32, #tpu.memory_space<vmem>>, vector<8x1xf32>,
    return
  }
  func.func @transform_0(%arg0: i32) -> (i32, i32) {
    %c0_i32 = arith.constant 0 : i32
    %c0_i32_0 = arith.constant 0 : i32
    return %c0_i32, %arg0 : i32, i32
  }
  func.func @transform_1(%arg0: i32) -> (i32, i32) {
    %c0_i32 = arith.constant 0 : i32
    %c0_i32_0 = arith.constant 0 : i32
    return %c0_i32, %arg0 : i32, i32
  }
  func.func @transform_2(%arg0: i32) -> (i32, i32) {
    %c0_i32 = arith.constant 0 : i32
    %c0_i32_0 = arith.constant 0 : i32
    %c0_i32_1 = arith.constant 0 : i32
    return %c0_i32, %c0_i32_0 : i32, i32
  }
  func.func @transform_3(%arg0: i32) -> (i32, i32) {
    %c0_i32 = arith.constant 0 : i32
    %c0_i32_0 = arith.constant 0 : i32
    %c0_i32_1 = arith.constant 0 : i32
    return %c0_i32, %c0_i32_0 : i32, i32
  }
  func.func @transform_4(%arg0: i32) -> (i32, i32) {
    %c0_i32 = arith.constant 0 : i32
    %c0_i32_0 = arith.constant 0 : i32
    %c0_i32_1 = arith.constant 0 : i32
    return %c0_i32, %c0_i32_0 : i32, i32
  }
  func.func @transform_5(%arg0: i32) -> (i32, i32) {
    %c0_i32 = arith.constant 0 : i32
    %c0_i32_0 = arith.constant 0 : i32
    %c0_i32_1 = arith.constant 0 : i32
    return %c0_i32, %c0_i32_0 : i32, i32
  }
}

</mosaic_0001>

<bundles_post_ra>
// kernel: bce_dice_loss.1
= control target key start
LH: loop header
LB: loop body
LE: loop exit
PB: predicated region body
PF: predicated region fallthrough
CT: control target
= control target key end

     0   :  { %vm19_vm0 = vcmask 7168   ;;  %v104_v1 = vmov 0.0   ;;  %vm55_vm2 = vcmask 523264   ;;  %s185_s0 = inlined_call_operand.vmem [shape: f32[8,64], index: 0, kind: input, shape index: {}]   ;;  %s186_s2 = inlined_call_operand.vmem [shape: f32[8,1], index: 2, kind: output, shape index: {0}]   ;;  %s187_s1 = inlined_call_operand.vmem [shape: f32[8,64], index: 1, kind: input, shape index: {}]   ;;  %s188_s4 = inlined_call_operand.vmem [shape: f32[8,1], index: 4, kind: output, shape index: {2}]   ;;  %s189_s5 = inlined_call_operand.vmem [shape: f32[8,1], index: 5, kind: output, shape index: {3}]   ;;  %s190_s3 = inlined_call_operand.vmem [shape: f32[8,1], index: 3, kind: output, shape index: {1}]  }
   0x1   :  { %v24_v0 = vld [vmem:[%s185_s0] sm:$0xff]  ;;  %20 = vst.msk [vmem:[%s186_s2] sm:$0xff] %vm19_vm0, %v104_v1  ;;  %22 = vst.msk [vmem:[%s188_s4] sm:$0xff] %vm19_vm0, %v104_v1 }
   0x2   :  { %v28_v2 = vand.u32 2147483647, %v24_v0  ;;  %v26_v9 = vsub.f32 0.0, %v24_v0  ;;  %v25_v17 = vld [vmem:[%s187_s1] sm:$0xff]  ;;  %23 = vst.msk [vmem:[%s189_s5] sm:$0xff] %vm19_vm0, %v104_v1  ;;  %21 = vst.msk [vmem:[%s190_s3] sm:$0xff] %vm19_vm0, %v104_v1 }
   0x3   :  { %v50_v22 = vsub.f32 1.0, %v25_v17  ;;  %v76_v33 = vsel %vm55_vm2, %v25_v17, 0.0 }
   0x4   :  { %v29_v3 = vsub.f32 0.0, %v28_v2  ;;  %v27_v13 = vmax.f32 %v26_v9, 0.0 }
   0x6   :  { %v30_v4 = vmul.f32 1.442695, %v29_v3 }
   0x8   :  { %98 = vpow2.f32 %v30_v4  ;;  %v54_v35 = vld [vmem:[%s186_s2] sm:$0xff] }
   0x9   :  { %v69_v38 = vld [vmem:[%s188_s4] sm:$0xff] }
   0xa   :  { %v62_v40 = vld [vmem:[%s190_s3] sm:$0xff] }
   0xb   :  { %v75_v42 = vld [vmem:[%s189_s5] sm:$0xff] }
  0x15   :  { %v99_v5 = vpop.eup %98 }
  0x16   :  { %v32_v6 = vadd.f32 1.0, %v99_v5  ;;  %v35_v7 = vmul.f32 -0.5, %v99_v5  ;;  %v38_v10 = vand.u32 2147483647, %v99_v5 }
  0x18   :  { %100 = vlog2.f32 %v32_v6  ;;  %v36_v8 = vadd.f32 1.0, %v35_v7  ;;  %vm39_vm1 = vcmp.lt.f32.partialorder %v38_v10, 0.0004427343 }
  0x1a   :  { %v37_v11 = vmul.f32 %v99_v5, %v36_v8 }
  0x25   :  { %v101_v12 = vpop.eup %100 }
  0x26   :  { %v34_v14 = vmul.f32 0.6931472, %v101_v12 }
  0x28   :  { %v40_v15 = vsel %vm39_vm1, %v37_v11, %v34_v14 }
  0x29   :  { %v41_v16 = vadd.f32 %v40_v15, %v27_v13 }
  0x2b   :  { %v42_v18 = vsub.f32 0.0, %v41_v16  ;;  %v46_v19 = vadd.f32 %v41_v16, %v24_v0 }
  0x2d   :  { %v45_v20 = vmax.f32 %v42_v18, -100.0  ;;  %v47_v21 = vsub.f32 0.0, %v46_v19  ;;  %v43_v23 = vmul.f32 1.442695, %v42_v18 }
  0x2f   :  { %v48_v24 = vmax.f32 %v47_v21, -100.0  ;;  %v49_v25 = vmul.f32 %v45_v20, %v25_v17  ;;  %102 = vpow2.f32 %v43_v23 }
  0x31   :  { %v51_v26 = vmul.f32 %v50_v22, %v48_v24 }
  0x33   :  { %v52_v27 = vadd.f32 %v51_v26, %v49_v25 }
  0x35   :  { %v53_v28 = vsub.f32 0.0, %v52_v27 }
  0x37   :  { %v56_v29 = vsel %vm55_vm2, %v53_v28, 0.0 }
  0x38   :  { %57 = vadd.xlane.f32.xlu0 %v56_v29 }
  0x3c   :  { %v103_v30 = vpop.eup %102 }
  0x3d   :  { %v70_v31 = vsel %vm55_vm2, %v103_v30, 0.0  ;;  %v63_v32 = vmul.f32 %v103_v30, %v25_v17 }
  0x3e   :  { %71 = vadd.xlane.f32.xlu1 %v70_v31 }
  0x3f   :  { %v64_v34 = vsel %vm55_vm2, %v63_v32, 0.0 }
  0x40   :  { %65 = vadd.xlane.f32.xlu0 %v64_v34 }
  0x42   :  { %77 = vadd.xlane.f32.xlu1 %v76_v33 }
  0xc1   :  { %v58_v36 = vpop.xlane.xlu0 %57 }
  0xc2   :  { %v59_v37 = vadd.f32 %v58_v36, %v54_v35 }
  0xc4   :  { %61 = vst.msk [vmem:[%s186_s2] sm:$0xff] %vm19_vm0, %v59_v37 }
  0xc7   :  { %v72_v39 = vpop.xlane.xlu1 %71 }
  0xc8   :  { %v73_v41 = vadd.f32 %v72_v39, %v69_v38 }
  0xc9   :  { %v66_v43 = vpop.xlane.xlu0 %65 }
  0xca   :  { %74 = vst.msk [vmem:[%s188_s4] sm:$0xff] %vm19_vm0, %v73_v41  ;;  %v67_v44 = vadd.f32 %v66_v43, %v62_v40 }
  0xcb   :  { %v78_v45 = vpop.xlane.xlu1 %77 }
  0xcc   :  { %v79_v46 = vadd.f32 %v78_v45, %v75_v42  ;;  %68 = vst.msk [vmem:[%s190_s3] sm:$0xff] %vm19_vm0, %v67_v44 }
  0xce   :  { %80 = vst.msk [vmem:[%s189_s5] sm:$0xff] %vm19_vm0, %v79_v46 }

</bundles_post_ra>
